<compile_context>
chip_gen: v7x
topology: tpu7x:2x2x1
jax: 0.10.0
libtpu: 0.0.40
codegen_flags: <defaults>
</compile_context>

<pallas_src>
import functools

import jax
import jax.numpy as jnp
from jax.experimental import pallas as pl
from jax.experimental.pallas import tpu as pltpu


def _mcattn_kernel(ones_ref, cw_ref, hs_ref, emb_ref, embbd_ref, mask_ref,
                   out_ref, *, Bb, S, C, W, H, inv_temper):
    """Bb batches per program; all C channels fused into three MXU dots."""
    CW = C * W

    hs = hs_ref[...]          # (Bb, S, H)       bf16
    emb = emb_ref[...]        # (Bb, C*W, H)     bf16
    emb_bd = embbd_ref[...]   # (Bb, C*W, C*H)   bf16, block-diagonal (weight-free)
    mask = mask_ref[...]      # (Bb, S, C*W)     f32, clamped in wrapper
    w_row = cw_ref[...]       # (Bb, 1, C*W)     f32, softmaxed channel weight per column
    ones_bd = ones_ref[...]   # (C*W, C*W)       f32, block-diagonal ones (grid-resident)

    # u[b, s, c*W+w] = <hs[b,s], emb[b,c,w]> / sqrt(H)  - batched NT matmul on the MXU.
    u = jnp.einsum('bsh,bwh->bsw', hs, emb,
                   preferred_element_type=jnp.float32) * inv_temper

    # TODO(synk): exp is intentionally unstabilized (no per-channel max subtraction)
    # to match the torch reference bit-for-bit; fragile once |u| ~ 88 in f32.
    delta = jnp.exp(u) * mask                                      # (Bb, S, C*W) f32

    # Per-channel softmax denominator: stack the Bb batches into one tall operand
    # and hit the VMEM-resident block-diagonal ones constant with a single dot.
    denom = jnp.dot(delta.reshape(Bb * S, CW), ones_bd,
                    preferred_element_type=jnp.float32).reshape(Bb, S, CW)

    # Channel weight folded in here (16x32 VPU mul instead of 32x128);
    # the divide goes to the EUP slot via approx reciprocal.
    attn = delta * (w_row * pl.reciprocal(denom + 1e-10, approx=True))

    # Attended characters for all channels at once, already in (S, C*H) layout.
    ca = jnp.einsum('bsw,bwh->bsh', attn.astype(emb_bd.dtype), emb_bd,
                    preferred_element_type=jnp.float32)
    out_ref[...] = ca.astype(out_ref.dtype)


def _pick_batch_block(B):
    """Largest divisor of B <= 8 that keeps >= 2 grid steps (v7x has 2 TCs)."""
    best = 1
    for bb in range(1, min(B, 8) + 1):
        if B % bb == 0 and (B == 1 or B // bb >= 2):
            best = bb
    return best


@jax.jit
def multi_channel_attention(word_seq, hidden_state, char_word_mask_matrix,
                            channel_ids, word_embedding_table,
                            channel_weight_table):
    B, S, H = hidden_state.shape
    C = char_word_mask_matrix.shape[1]
    W = word_seq.shape[2]
    CW, CH = C * W, C * H
    inv_temper = 1.0 / (float(H) ** 0.5)

    # ---- glue fused by jit with the pallas_call (gather / permute / clamp / softmax) ----
    embedding = word_embedding_table[word_seq]                       # (B, C, W, H) f32
    emb_flat = embedding.reshape(B, CW, H).astype(jnp.bfloat16)      # (B, C*W, H)

    # Weight-free block-diagonal embedding, built once outside the kernel:
    #   emb_bd[b, c*W+w, c2*H+h] = emb[b, c, w, h] if c == c2 else 0
    eye_c = jnp.eye(C, dtype=embedding.dtype)
    emb_bd = (embedding[:, :, :, None, :] * eye_c[None, :, None, :, None])
    emb_bd = emb_bd.reshape(B, CW, CH).astype(jnp.bfloat16)          # (B, C*W, C*H)

    mask_p = jnp.clip(char_word_mask_matrix, 0.0, 1.0)               # clamp in wrapper
    mask_p = jnp.transpose(mask_p, (0, 2, 1, 3)).reshape(B, S, CW)   # (B, S, C*W)

    channel_w = channel_weight_table[channel_ids][..., 0]            # (B, C)
    channel_w = jax.nn.softmax(channel_w, axis=1).astype(jnp.float32)
    cw_row = jnp.repeat(channel_w, W, axis=1).reshape(B, 1, CW)      # (B, 1, C*W)

    # Block-diagonal ones constant for the per-channel denominator reduce.
    ones_bd = jnp.kron(jnp.eye(C, dtype=jnp.float32),
                       jnp.ones((W, W), dtype=jnp.float32))          # (C*W, C*W)

    hs = hidden_state.astype(jnp.bfloat16)

    Bb = _pick_batch_block(B)
    grid = (B // Bb,)

    kernel = functools.partial(_mcattn_kernel, Bb=Bb, S=S, C=C, W=W, H=H,
                               inv_temper=inv_temper)

    flops = 2 * B * S * CW * (H + CW + CH)
    bytes_accessed = (ones_bd.size * 4 + cw_row.size * 4 + hs.size * 2 +
                      emb_flat.size * 2 + emb_bd.size * 2 + mask_p.size * 4 +
                      B * S * CH * 4)

    out = pl.pallas_call(
        kernel,
        out_shape=jax.ShapeDtypeStruct((B, S, CH), jnp.float32),
        grid=grid,
        in_specs=[
            pl.BlockSpec((CW, CW), lambda i: (0, 0)),         # ones_bd (VMEM-resident)
            pl.BlockSpec((Bb, 1, CW), lambda i: (i, 0, 0)),   # channel weight row
            pl.BlockSpec((Bb, S, H), lambda i: (i, 0, 0)),    # hidden state (bf16)
            pl.BlockSpec((Bb, CW, H), lambda i: (i, 0, 0)),   # flat embeddings (bf16)
            pl.BlockSpec((Bb, CW, CH), lambda i: (i, 0, 0)),  # block-diag embeddings (bf16)
            pl.BlockSpec((Bb, S, CW), lambda i: (i, 0, 0)),   # clamped mask (f32)
        ],
        out_specs=pl.BlockSpec((Bb, S, CH), lambda i: (i, 0, 0)),
        compiler_params=pltpu.CompilerParams(
            dimension_semantics=("parallel",)),               # >=2 steps -> both v7x TCs busy
        cost_estimate=pl.CostEstimate(
            flops=flops, transcendentals=B * S * CW,
            bytes_accessed=bytes_accessed),
    )(ones_bd, cw_row, hs, emb_flat, emb_bd, mask_p)

    return out                                                # (B, S, C*H) - final layout


def _reference(word_seq, hidden_state, char_word_mask_matrix, channel_ids,
               word_embedding_table, channel_weight_table):
    """Pure-JAX f32 transcription of the torch forward, for verification."""
    B, S, H = hidden_state.shape
    C = char_word_mask_matrix.shape[1]
    temper = float(H) ** 0.5

    embedding = word_embedding_table[word_seq]                 # (B, C, W, H)
    tmp = jnp.transpose(embedding, (0, 1, 3, 2))               # (B, C, H, W)
    tmp_hidden = jnp.broadcast_to(hidden_state[:, None], (B, C, S, H))
    u = jnp.matmul(tmp_hidden, tmp) / temper                   # (B, C, S, W)
    mask = jnp.clip(char_word_mask_matrix, 0.0, 1.0)
    delta = jnp.exp(u) * mask
    s = jnp.sum(delta, axis=3, keepdims=True)
    attn = delta / (s + 1e-10)                                 # (B, C, S, W)
    ca = jnp.matmul(attn, embedding)                           # (B, C, S, H)
    cw = channel_weight_table[channel_ids][..., 0]             # (B, C)
    cw = jax.nn.softmax(cw, axis=1).reshape(B, C, 1, 1)
    ca = ca * cw
    ca = jnp.transpose(ca, (0, 2, 1, 3)).reshape(B, S, C * H)
    return ca


if __name__ == "__main__":
    # Module hyper-params
    ngram_size = 50
    hidden_size = 32
    cat_num = 4

    # Forward shapes
    B, C, S, W = 2, 4, 16, 8   # batch, channels, char_seq_len, word_seq_len

    key = jax.random.PRNGKey(0)
    k_emb, k_cw, k_ws, k_hs, k_mask = jax.random.split(key, 5)

    # Deterministic parameter init (padding_idx=0 -> row 0 zeroed).
    word_embedding_table = jax.random.normal(
        k_emb, (ngram_size, hidden_size), dtype=jnp.float32) * 0.1
    word_embedding_table = word_embedding_table.at[0].set(0.0)
    channel_weight_table = jax.random.normal(
        k_cw, (cat_num, 1), dtype=jnp.float32)

    # Inputs
    word_seq = jax.random.randint(k_ws, (B, C, W), 0, ngram_size, dtype=jnp.int32)
    hidden_state = jax.random.normal(k_hs, (B, S, hidden_size), dtype=jnp.float32)
    # values in [0, 2) so the clamp-to-[0,1] actually matters
    char_word_mask_matrix = jax.random.uniform(
        k_mask, (B, C, S, W), dtype=jnp.float32) * 2.0
    channel_ids = jnp.broadcast_to(
        jnp.arange(C, dtype=jnp.int32) % cat_num, (B, C))

    out = multi_channel_attention(word_seq, hidden_state, char_word_mask_matrix,
                                  channel_ids, word_embedding_table,
                                  channel_weight_table)
    out = jax.block_until_ready(out)

    ref = _reference(word_seq, hidden_state, char_word_mask_matrix, channel_ids,
                     word_embedding_table, channel_weight_table)

    assert out.shape == (B, S, C * hidden_size), out.shape
    # bf16 MXU operands + approx reciprocal -> loosened tolerance vs the f32 reference.
    assert jnp.allclose(out, ref, atol=5e-3, rtol=5e-2), \
        float(jnp.max(jnp.abs(out - ref)))
    print("KERNEL_OK")
</pallas_src>

<mosaic_0001>
module attributes {stable_mosaic.version = 11 : i64} {
  func.func @_mcattn_kernel(%arg0: i32, %arg1: memref<32x32xf32, #tpu.memory_space<vmem>>, %arg2: memref<1x1x32xf32, #tpu.memory_space<vmem>>, %arg3: memref<1x16x32xbf16, #tpu.memory_space<vmem>>, %arg4: memref<1x32x32xbf16, #tpu.memory_space<vmem>>, %arg5: memref<1x32x128xbf16, #tpu.memory_space<vmem>>, %arg6: memref<1x16x32xf32, #tpu.memory_space<vmem>>, %arg7: memref<1x16x128xf32, #tpu.memory_space<vmem>>) attributes {dimension_semantics = [#tpu.dimension_semantics<parallel>], iteration_bounds = array<i64: 2>, scalar_prefetch = 0 : i64, scratch_operands = 0 : i64, tpu.core_type = #tpu.core_type<tc>, window_params = [{pipeline_mode = #tpu.pipeline_mode<synchronous>, transform_indices = @transform_0, window_bounds = array<i64: 32, 32>}, {transform_indices = @transform_1, window_bounds = array<i64: 1, 1, 32>}, {transform_indices = @transform_2, window_bounds = array<i64: 1, 16, 32>}, {transform_indices = @transform_3, window_bounds = array<i64: 1, 32, 32>}, {transform_indices = @transform_4, window_bounds = array<i64: 1, 32, 128>}, {transform_indices = @transform_5, window_bounds = array<i64: 1, 16, 32>}, {transform_indices = @transform_6, window_bounds = array<i64: 1, 16, 128>}]} {
    %c0 = arith.constant 0 : index
    %c0_0 = arith.constant 0 : index
    %c0_1 = arith.constant 0 : index
    %0 = vector.load %arg3[%c0, %c0_0, %c0_1] : memref<1x16x32xbf16, #tpu.memory_space<vmem>>, vector<1x16x32xbf16>
    %c0_2 = arith.constant 0 : index
    %c0_3 = arith.constant 0 : index
    %c0_4 = arith.constant 0 : index
    %1 = vector.load %arg4[%c0_2, %c0_3, %c0_4] : memref<1x32x32xbf16, #tpu.memory_space<vmem>>, vector<1x32x32xbf16>
    %c0_5 = arith.constant 0 : index
    %c0_6 = arith.constant 0 : index
    %c0_7 = arith.constant 0 : index
    %2 = vector.load %arg5[%c0_5, %c0_6, %c0_7] : memref<1x32x128xbf16, #tpu.memory_space<vmem>>, vector<1x32x128xbf16>
    %c0_8 = arith.constant 0 : index
    %c0_9 = arith.constant 0 : index
    %c0_10 = arith.constant 0 : index
    %3 = vector.load %arg6[%c0_8, %c0_9, %c0_10] : memref<1x16x32xf32, #tpu.memory_space<vmem>>, vector<1x16x32xf32>
    %c0_11 = arith.constant 0 : index
    %c0_12 = arith.constant 0 : index
    %c0_13 = arith.constant 0 : index
    %4 = vector.load %arg2[%c0_11, %c0_12, %c0_13] : memref<1x1x32xf32, #tpu.memory_space<vmem>>, vector<1x1x32xf32>
    %c0_14 = arith.constant 0 : index
    %c0_15 = arith.constant 0 : index
    %5 = vector.load %arg1[%c0_14, %c0_15] : memref<32x32xf32, #tpu.memory_space<vmem>>, vector<32x32xf32>
    "tpu.trace_start"() <{level = 10 : i32, message = "bsh,bwh->bsw"}> : () -> ()
    %cst = arith.constant dense<0.000000e+00> : vector<1x16x32xf32>
    %6 = tpu.matmul %0, %1, %cst {dimension_numbers = #tpu.dot_dimension_numbers<[2], [2], [1], [1], [0, 0, 0, 1, 1, 1], [0], [0]>} : vector<1x16x32xbf16>, vector<1x32x32xbf16>, vector<1x16x32xf32> -> vector<1x16x32xf32>
    "tpu.trace_stop"() : () -> ()
    %cst_16 = arith.constant 0.176776692 : f32
    %7 = vector.broadcast %cst_16 : f32 to vector<1x16x32xf32>
    %8 = arith.mulf %6, %7 : vector<1x16x32xf32>
    %9 = math.exp %8 : vector<1x16x32xf32>
    %10 = arith.mulf %9, %3 : vector<1x16x32xf32>
    %11 = vector.shape_cast %10 : vector<1x16x32xf32> to vector<16x32xf32>
    %cst_17 = arith.constant dense<0.000000e+00> : vector<16x32xf32>
    %12 = tpu.matmul %11, %5, %cst_17 {dimension_numbers = #tpu.dot_dimension_numbers<[1], [0], [0], [1], [0, 0, 1, 1], [], []>} : vector<16x32xf32>, vector<32x32xf32>, vector<16x32xf32> -> vector<16x32xf32>
    %13 = vector.shape_cast %12 : vector<16x32xf32> to vector<1x16x32xf32>
    %cst_18 = arith.constant 1.000000e-10 : f32
    %14 = vector.broadcast %cst_18 : f32 to vector<1x16x32xf32>
    %15 = arith.addf %13, %14 : vector<1x16x32xf32>
    %16 = tpu.reciprocal %15 {approx = true} : vector<1x16x32xf32> -> vector<1x16x32xf32>
    %17 = vector.broadcast %4 : vector<1x1x32xf32> to vector<1x16x32xf32>
    %18 = arith.mulf %17, %16 : vector<1x16x32xf32>
    %19 = arith.mulf %10, %18 : vector<1x16x32xf32>
    %20 = arith.truncf %19 : vector<1x16x32xf32> to vector<1x16x32xbf16>
    "tpu.trace_start"() <{level = 10 : i32, message = "bsw,bwh->bsh"}> : () -> ()
    %cst_19 = arith.constant dense<0.000000e+00> : vector<1x16x128xf32>
    %21 = tpu.matmul %20, %2, %cst_19 {dimension_numbers = #tpu.dot_dimension_numbers<[2], [1], [1], [2], [0, 0, 0, 1, 1, 2], [0], [0]>} : vector<1x16x32xbf16>, vector<1x32x128xbf16>, vector<1x16x128xf32> -> vector<1x16x128xf32>
    "tpu.trace_stop"() : () -> ()
    %c0_20 = arith.constant 0 : index
    %c0_21 = arith.constant 0 : index
    %c0_22 = arith.constant 0 : index
    %22 = vector.load %arg7[%c0_20, %c0_21, %c0_22] : memref<1x16x128xf32, #tpu.memory_space<vmem>>, vector<1x16x128xf32>
    tpu.vector_store %arg7[%c0_20, %c0_21, %c0_22], %21 {strides = array<i32>} : memref<1x16x128xf32, #tpu.memory_space<vmem>>, vector<1x16x128xf32>,
    return
  }
  func.func @transform_0(%arg0: i32) -> (i32, i32) {
    %c0_i32 = arith.constant 0 : i32
    %c0_i32_0 = arith.constant 0 : i32
    %c0_i32_1 = arith.constant 0 : i32
    return %c0_i32, %c0_i32_0 : i32, i32
  }
  func.func @transform_1(%arg0: i32) -> (i32, i32, i32) {
    %c0_i32 = arith.constant 0 : i32
    %c0_i32_0 = arith.constant 0 : i32
    %c0_i32_1 = arith.constant 0 : i32
    return %arg0, %c0_i32, %c0_i32_0 : i32, i32, i32
  }
  func.func @transform_2(%arg0: i32) -> (i32, i32, i32) {
    %c0_i32 = arith.constant 0 : i32
    %c0_i32_0 = arith.constant 0 : i32
    %c0_i32_1 = arith.constant 0 : i32
    return %arg0, %c0_i32, %c0_i32_0 : i32, i32, i32
  }
  func.func @transform_3(%arg0: i32) -> (i32, i32, i32) {
    %c0_i32 = arith.constant 0 : i32
    %c0_i32_0 = arith.constant 0 : i32
    %c0_i32_1 = arith.constant 0 : i32
    return %arg0, %c0_i32, %c0_i32_0 : i32, i32, i32
  }
  func.func @transform_4(%arg0: i32) -> (i32, i32, i32) {
    %c0_i32 = arith.constant 0 : i32
    %c0_i32_0 = arith.constant 0 : i32
    %c0_i32_1 = arith.constant 0 : i32
    return %arg0, %c0_i32, %c0_i32_0 : i32, i32, i32
  }
  func.func @transform_5(%arg0: i32) -> (i32, i32, i32) {
    %c0_i32 = arith.constant 0 : i32
    %c0_i32_0 = arith.constant 0 : i32
    %c0_i32_1 = arith.constant 0 : i32
    return %arg0, %c0_i32, %c0_i32_0 : i32, i32, i32
  }
  func.func @transform_6(%arg0: i32) -> (i32, i32, i32) {
    %c0_i32 = arith.constant 0 : i32
    %c0_i32_0 = arith.constant 0 : i32
    %c0_i32_1 = arith.constant 0 : i32
    return %arg0, %c0_i32, %c0_i32_0 : i32, i32, i32
  }
}

</mosaic_0001>

<bundles_post_ra>
// kernel: squeeze.1
= control target key start
LH: loop header
LB: loop body
LE: loop exit
PB: predicated region body
PF: predicated region fallthrough
CT: control target
= control target key end

     0   :  { %vm7_vm0 = vcmask 31744   ;;  %s39_s0 = inlined_call_operand.vmem [shape: f32[8], index: 0, kind: input, shape index: {}]   ;;  %s40_s1 = inlined_call_operand.vmem [shape: f32[2,4], index: 1, kind: output, shape index: {}]  }
   0x1   :  { %v4_v0 = vld [vmem:[%s39_s0] sm:$0x1]  ;;  %s22_s0 = smov 124  }
   0x2   :  { %5 = vst [vmem:[#allocation1] sm:$0x1] %v4_v0 }
   0x9   :  { %v9_v1 = vld [vmem:[#allocation1] sm:$0x1]  }
   0xa   :  { %v6_v2 = vld [vmem:[#allocation1] sm:$0x1]   ;;  %10 = vrot.lane.b32.xlu0 %v9_v1, %s22_s0 }
   0xb   :  { %8 = vst.msk [vmem:[#allocation0] sm:$0x1] %vm7_vm0, %v6_v2  }
  0x7c   :  { %v11_v3 = vpop.permute.xlu0 %10  }
  0x7d   :  { %14 = vst.msk [vmem:[#allocation0 + $0x1] sm:$0x1] %vm7_vm0, %v11_v3  }
  0x84   :  { %v18_v4 = vld [vmem:[#allocation0] sm:$0x3] }
  0x85   :  { %20 = vst [vmem:[%s40_s1] sm:$0x3] %v18_v4 }

// kernel: multi_channel_attention.1
= control target key start
LH: loop header
LB: loop body
LE: loop exit
PB: predicated region body
PF: predicated region fallthrough
CT: control target
= control target key end

     0   :  { %11 = vsyncpa [#allocation3], 0  ;;  %s1080_s0 = inlined_call_operand.vmem [shape: f32[32,32], index: 0, kind: input, shape index: {}]   ;;  %s1081_s1 = inlined_call_operand.vmem [shape: f32[2,1,32], index: 1, kind: input, shape index: {}]   ;;  %s1082_s2 = inlined_call_operand.vmem [shape: bf16[2,16,32], index: 2, kind: input, shape index: {}]   ;;  %s1083_s3 = inlined_call_operand.vmem [shape: bf16[2,32,32], index: 3, kind: input, shape index: {}]   ;;  %s1084_s4 = inlined_call_operand.vmem [shape: bf16[2,32,128], index: 4, kind: input, shape index: {}]   ;;  %s1085_s5 = inlined_call_operand.vmem [shape: f32[2,16,32], index: 5, kind: input, shape index: {}]   ;;  %s1086_s6 = inlined_call_operand.hbm [shape: f32[2,16,128], index: 6, kind: output, shape index: {}]  }
   0x1   :  { %13 = vsyncpa [#allocation3 + $0x1], 0  ;;  %s931_s21 = smov 0   ;;  %s933_s22 = smov 0  }
   0x2   :  { %s935_s23 = smov 0   ;;  %s937_s24 = smov 0  }
   0x3 LB: > { %s952_s25 = sadd.s32 4294967295, %s889_s24   ;;  %s691_s26 = sadd.s32 4294967294, %s889_s24   ;;  %s889_s24 = sphi %s937_s24, %s1092_s24   ;;  %s885_s23 = sphi %s935_s23, %s1091_s23   ;;  %s881_s22 = sphi %s933_s22, %s1090_s22   ;;  %s877_s21 = sphi %s931_s21, %s1089_s21  }
   0x4   : > { %s956_s27 = sadd.s32 1, %s889_s24   ;;  %s177_s28 = sadd.s32 1, %s885_s23 }
   0x5   : > { %s174_s29 = ssub.s32 %s889_s24, %s956_s27  ;;  %p187_p0 = scmp.ne.s32.totalorder %s885_s23, %s881_s22 }
   0x6   : > { %p175_p1 = scmp.eq.s32.totalorder %s174_s29, 0  ;;  %p188_p2 = scmp.eq.s32.totalorder %s952_s25, 1 }
   0x7   : > { %p193_p3 = scmp.ne.s32.totalorder %s881_s22, %s877_s21  ;;  %p194_p4 = scmp.eq.s32.totalorder %s691_s26, 1 }
   0x8   : > { %s967_s30 = scalar_select %p175_p1, %s885_s23, %s177_s28  }
   0x9   : > { %p969_p5 = por %p188_p2, %p187_p0  ;;  %p973_p6 = por %p194_p4, %p193_p3 }
   0xa   : > { %p694_p7 = scmp.ge.s32.totalorder %s889_s24, 1  ;;  %p253_p8 = scmp.lt.s32.totalorder %s889_s24, 3 }
   0xc   : > { %p254_p9 = pnand %p694_p7, %p253_p8 }
   0xd   : > { %p301_p10 = scmp.lt.s32.totalorder (!%p254_p9), %s952_s25, 1  ;;  %v891_v0 = vmov (!%p254_p9), 0.0   ;;  %vm892_vm0 = vmmov (!%p254_p9), 0   ;;  %vm357_vm1 = vcmask (!%p254_p9), 261120   ;;  %v338_v6 = vld [vmem:[%s1080_s0] sm:$0xff] (!%p254_p9)  ;;  %v339_v7 = vld [vmem:[%s1080_s0 + $0x8] sm:$0xff] (!%p254_p9) }
   0xe   : > { %257 = sbr.rel (%p254_p9) target bundleno = 734 (0x2de), region = 44  ;;  %736 = vmatprep.subr.bf16.mxu0 (!%p254_p9), %v891_v0  ;;  %740 = vmatprep.mubr.msk.bf16.mxu0 (!%p254_p9), %vm892_vm0, %v891_v0  ;;  %v340_v8 = vld [vmem:[%s1080_s0 + $0x10] sm:$0xff] (!%p254_p9)  ;;  %v763_v9 = vpack.c.bf16 (!%p254_p9), %v339_v7, %v338_v6  ;;  %v341_v10 = vld [vmem:[%s1080_s0 + $0x18] sm:$0xff] (!%p254_p9)  ;;  %s723_s12 = sshll.u32 (!%p254_p9), %s952_s25, 8 }
   0xf   : > { %v767_v11 = vpack.c.bf16 (!%p254_p9), %v341_v10, %v340_v8 }
  0x10   : > { %764 = vmatprep.subr.bf16.mxu1 (!%p254_p9), %v763_v9 }
  0x11   : > { %766 = vmatpush3.bf16.msra.mxu1 (!%p254_p9), %v763_v9 }
  0x12   : > { %768 = vmatprep.subr.bf16.mxu1 (!%p254_p9), %v767_v11 }
  0x15   : > { %s982_s9 = scalar_select %p301_p10, %s952_s25, 1  ;;  %770 = vmatpush3.bf16.msra.mxu1 %v767_v11 }
  0x16   : > { %755 = vmatprep.subr.bf16.mxu1 %v891_v0  ;;  %s893_s25 = smov [#allocation2]  }
  0x17   : > { %s985_s10 = sshll.u32 %s982_s9, 4  ;;  %s719_s11 = sshll.u32 %s982_s9, 3 }
  0x18   : > { %s313_s14 = scalar_lea.vmem %s1083_s3, %s985_s10  ;;  %s308_s17 = scalar_lea.vmem %s1082_s2, %s719_s11 }
  0x19   : > { %v814_v1 = vld [vmem:[%s313_s14] sm:$0xff]   ;;  %s999_s20 = scalar_lea.vmem %s1084_s4, %s985_s10  ;;  %v815_v3 = vld [vmem:[%s313_s14 + $0x8] sm:$0xff]   ;;  %s323_s18 = scalar_lea.vmem %s1085_s5, %s985_s10 }
  0x1a   : > { %v362_v2 = vsel %vm357_vm1, %v814_v1, 0  ;;  %v365_v4 = vsel %vm357_vm1, %v815_v3, 0  ;;  %v816_v5 = vld [vmem:[%s308_s17] sm:$0xff]   ;;  %v336_v22 = vld [vmem:[%s323_s18 + $0x8] sm:$0xff]  ;;  %s303_s26 = scalar_lea.vmem %s1081_s1, %s982_s9  ;;  %s1037_s14 = scalar_lea.hbm %s1086_s6, %s723_s12 }
  0x1b   : > { %737 = vmatpush3.bf16.xpose.msra.mxu0 %v362_v2  ;;  %v335_v20 = vld [vmem:[%s323_s18] sm:$0xff]  ;;  %v818_v27 = vld [vmem:[%s999_s20 + $0x8] sm:$0xff]   ;;  %s831_s17 = sshll.u32 %s893_s25, 4  ;;  %s832_s17 = int_to_ptr.vmem [resolvable:$false] %s831_s17 }
  0x1c   : > { %738 = vmatprep.subr.bf16.mxu0 %v891_v0  ;;  %v817_v26 = vld [vmem:[%s999_s20] sm:$0xff]   ;;  %s298_s20 = sand.u32 1, %s881_s22   ;;  %s833_s18 = scalar_lea.vmem %s832_s17, 512 }
  0x1d   : > { %v710_v32 = vld [vmem:[%s303_s26] ss:$0 sm:$0xff]  ;;  %s695_s28 = sshll.u32 %s298_s20, 4  ;;  %s1039_s15 = scalar_lea.sflag [#allocation3], %s298_s20 }
  0x1e   : > { %s300_s29 = scalar_lea.vmem [#allocation2], %s695_s28 }
  0x1f   : > { %s584_s11 = sshll.u32 %s300_s29, 4  ;;  %s1032_s11 = int_to_ptr.vmem [resolvable:$true] %s584_s11 }
  0x20   : > { %s827_s16 = scalar_lea.vmem %s1032_s11, 256  ;;  %p834_p0 = scmp.lt.s32.totalorder %s1032_s11, %s832_s17 }
  0x21   : > { %p828_p11 = scmp.ne.s32.totalorder %s1032_s11, %s827_s16  ;;  %p835_p1 = scmp.lt.s32.totalorder %s833_s18, %s827_s16 }
  0x23   : > { %739 = vmatpush3.bf16.xpose.msra.mxu0 %v365_v4  ;;  %p829_p12 = pnand %p828_p11, %p969_p5  ;;  %p836_p2 = por %p835_p1, %p834_p0 }
  0x25   : > { %p830_p13 = pneg %p829_p12 }
  0x27   : > { %p837_p3 = pnand %p836_p2, %p830_p13 }
  0x2a   : > { %741 = vmatmul.mubr.msk.bf16.vlgmr.msra.gmra.mrb[0].mxu0 %vm357_vm1, %v816_v5 }
  0xfd   : > { %v401_v12 = vpop.f32.mrb[0].mxu0 }
  0xfe   : > { %v408_v13 = vmul.f32 0.17677669, %v401_v12  ;;  %v742_v14 = vpop.f32.mrb[1].mxu0 }
  0xff   : > { %v404_v15 = vpop.f32.mrb[2].mxu0 }
 0x100   : > { %v410_v16 = vmul.f32 1.442695, %v408_v13  ;;  %v409_v17 = vmul.f32 0.17677669, %v404_v15  ;;  %v743_v18 = vpop.f32.mrb[3].mxu0 }
 0x102   : > { %819 = vpow2.f32 %v410_v16  ;;  %v412_v19 = vmul.f32 1.442695, %v409_v17 }
 0x104   : > { %821 = vpow2.f32 %v412_v19 }
 0x10c   : > { %v820_v21 = vpop.eup %819 }
 0x10d   : > { %v414_v23 = vmul.f32 %v820_v21, %v335_v20 }
 0x10e   : > { %v822_v24 = vpop.eup %821 }
 0x10f   : > { %v415_v25 = vmul.f32 %v822_v24, %v336_v22  ;;  %752 = vmatprep.mubr.msk.f32.mxu1 %vm357_vm1, %v414_v23 }
 0x111   : > { %753 = vmatmul.mubr.msk.f32.vlgmr.msra.gmra.mrb[0].mxu1 %vm357_vm1, %v415_v25 }
 0x112   : > { %759 = vmatprep.mubr.msk.bf16.mxu1 %vm892_vm0, %v891_v0  ;;  %756 = vmatpush3.bf16.msra.mxu1 %v817_v26 }
 0x113   : > { %757 = vmatprep.subr.bf16.mxu1 %v891_v0 }
 0x116   : > { %758 = vmatpush3.bf16.msra.mxu1 %v818_v27 }
 0x1e4   : > { %v754_v28 = vpop.f32.mrb[0].mxu1 }
 0x1e5   : > { %v498_v29 = vadd.f32 1e-10, %v754_v28  ;;  %v488_v30 = vpop.f32.mrb[1].mxu1 }
 0x1e6   : > { %v497_v31 = vadd.f32 1e-10, %v488_v30 }
 0x1e7   : > { %823 = vrcp.f32 %v498_v29 }
 0x1e8   : > { %825 = vrcp.f32 %v497_v31 }
 0x1f1   : > { %v824_v33 = vpop.eup %823 }
 0x1f2   : > { %v826_v34 = vpop.eup %825  ;;  %v508_v35 = vmul.f32 %v824_v33, %v710_v32 }
 0x1f3   : > { %v507_v36 = vmul.f32 %v826_v34, %v710_v32 }
 0x1f4   : > { %v510_v37 = vmul.f32 %v508_v35, %v415_v25 }
 0x1f5   : > { %v509_v38 = vmul.f32 %v507_v36, %v414_v23 }
 0x1f7   : > { %v511_v39 = vpack.c.bf16 %v510_v37, %v509_v38 }
 0x1f9   : > { %760 = vmatmul.mubr.msk.bf16.vlgmr.msra.gmra.mrb[4].mxu1 %vm357_vm1, %v511_v39 }
 0x2cc   : > { %v561_v40 = vpop.f32.mrb[4].mxu1 }
 0x2cd   : > { %568 = vst [vmem:[%s300_s29] sm:$0xff] %v561_v40  ;;  %v761_v41 = vpop.f32.mrb[5].mxu1 }
 0x2ce   : > { %v564_v42 = vpop.f32.mrb[6].mxu1 }
 0x2cf   : > { %569 = vst [vmem:[%s300_s29 + $0x8] sm:$0xff] %v564_v42  ;;  %v762_v43 = vpop.f32.mrb[7].mxu1 }
 0x2d0   : > { %840 = shalt.err (!%p837_p3)
}
 0x2d1   : > { %s841_s10 = scalar_lea.hbm %s1037_s14, 256  ;;  %s845_s20 = scalar_lea.hbm %s1086_s6, 512 }
 0x2d2   : > { %p842_p4 = scmp.ne.s32.totalorder %s1037_s14, %s841_s10  ;;  %p846_p9 = scmp.lt.u32.totalorder %s1037_s14, %s1086_s6 }
 0x2d3   : > { %p847_p10 = scmp.lt.u32.totalorder %s845_s20, %s841_s10  ;;  %p849_p12 = scmp.lt.u32.totalorder %s841_s10, %s1037_s14 }
 0x2d4   : > { %p843_p7 = pnand %p842_p4, %p969_p5 }
 0x2d5   : > { %p848_p11 = por %p847_p10, %p846_p9 }
 0x2d6   : > { %p844_p8 = pneg %p843_p7 }
 0x2d7   : > { %p850_p13 = por %p849_p12, %p848_p11 }
 0x2d9   : > { %p851_p0 = pnand %p850_p13, %p844_p8 }
 0x2db   : > { %854 = shalt.err (!%p851_p0)
}
 0x2dc   : > { %s894_s12 = smov 128   ;;  %s895_s9 = smov 8  }
 0x2dd   : > { %771 = dma.vmem_to_hbm [thread:$0]  (%p969_p5), %s1032_s11, 256, %s1037_s14, %s1039_s15, %s894_s12, %s894_s12, %s895_s9  }
 0x2de PF: > { %p777_p1 = scmp.ge.s32.totalorder %s889_s24, 2  ;;  %s599_s13 = sand.u32 1, %s877_s21  }
 0x2df   : > { %s600_s16 = scalar_lea.sflag [#allocation3], %s599_s13 }
 0x2e0   : > { %p774_p2 = pnand %p777_p1, %p973_p6 }
 0x2e2   : > { %872 = dma.done.wait (!%p774_p2), %s600_s16, 256  }
 0x2e3   : > { %874 = vsyncadd (!%p774_p2), %s600_s16, 4294967040  ;;  %p16_p3 = scmp.ge.s32.totalorder %s956_s27, 4   ;;  %s1089_s21 = smov %s881_s22 }
 0x2e4   : > { %s1090_s22 = smov %s885_s23  ;;  %s1091_s23 = smov %s967_s30 }
 0x2e5   : > { %s1092_s24 = smov %s956_s27  ;;  %18 = sbr.rel (!%p16_p3) target bundleno = 3 (0x3), region = 91 }
 0x2ec   :  { %605 = vsyncpa [#allocation3], 1 }
 0x2ed   :  { %607 = vsyncpa [#allocation3 + $0x1], 1 }

</bundles_post_ra>
